<compile_context>
chip_gen: v7x
topology: tpu7x:2x2x1
jax: 0.10.0
libtpu: 0.0.40
codegen_flags: <defaults>
</compile_context>

<pallas_src>
import math

import jax
import jax.numpy as jnp
from jax.experimental import pallas as pl
from jax.experimental.pallas import tpu as pltpu


def _hbm_copy_kernel(x_hbm_ref, o_hbm_ref, sem):
    # Single bulk HBM->HBM DMA. No grid, no VMEM staging, no vld/vst traffic.
    cp = pltpu.make_async_copy(x_hbm_ref, o_hbm_ref, sem)
    cp.start()
    cp.wait()


def base_preprocessor_copy(j: jax.Array) -> jax.Array:
    """Materialized identity: returns a fresh buffer with the contents of `j`.

    Implemented as one HBM->HBM DMA (memory_space=pl.ANY on both sides).
    """
    n = math.prod(j.shape)
    if n == 0:
        # Nothing to move; avoid issuing a zero-length DMA.
        return j

    itemsize = jnp.dtype(j.dtype).itemsize
    return pl.pallas_call(
        _hbm_copy_kernel,
        out_shape=jax.ShapeDtypeStruct(j.shape, j.dtype),
        in_specs=[pl.BlockSpec(memory_space=pl.ANY)],
        out_specs=pl.BlockSpec(memory_space=pl.ANY),
        scratch_shapes=[pltpu.SemaphoreType.DMA(())],
        # Advisory to the XLA scheduler: zero flops, pure memory traffic.
        cost_estimate=pl.CostEstimate(
            flops=0, transcendentals=0, bytes_accessed=2 * n * itemsize),
    )(j)


def base_preprocessor_forward(j: jax.Array, *, materialize: bool = False) -> jax.Array:
    """Identity forward for the (abstract) BasePreprocessor.

    Default (hot) path launches no kernel at all — the value is returned as-is,
    which removes 100% of the HBM traffic and launch overhead on every TPU
    generation. Set materialize=True to force a fresh output buffer via a
    single HBM->HBM DMA Pallas kernel.
    """
    if materialize:
        return base_preprocessor_copy(j)
    return j


class BasePreprocessorJAX:
    """JAX/Pallas mirror of the PyTorch BasePreprocessor base class."""

    def __init__(self):
        self.name = "base preprocessor"

    def __call__(self, j: jax.Array) -> jax.Array:
        # Abstract in PyTorch (raises NotImplementedError); the canonical
        # no-op here is "no kernel".
        return base_preprocessor_forward(j)


if __name__ == "__main__":
    key = jax.random.PRNGKey(0)
    x = jax.random.normal(key, (2, 4, 16, 16), dtype=jnp.float32)

    model = BasePreprocessorJAX()

    # Hot path: no kernel, identity.
    y = jax.block_until_ready(model(x))
    assert y.shape == x.shape and y.dtype == x.dtype
    assert bool(jnp.array_equal(y, x))

    # Materialized-copy path: exercises the HBM->HBM DMA Pallas kernel.
    y_copy = jax.block_until_ready(base_preprocessor_forward(x, materialize=True))
    assert y_copy.shape == x.shape and y_copy.dtype == x.dtype
    assert bool(jnp.array_equal(y_copy, x))

    print("KERNEL_OK")
</pallas_src>

<mosaic_0001>
module attributes {stable_mosaic.version = 11 : i64} {
  func.func @_hbm_copy_kernel(%arg0: memref<2x4x16x16xf32, #tpu.memory_space<any>>, %arg1: memref<2x4x16x16xf32, #tpu.memory_space<any>>, %arg2: memref<!tpu.dma_semaphore, #tpu.memory_space<semaphore_mem>>) attributes {dimension_semantics = [], scalar_prefetch = 0 : i64, scratch_operands = 1 : i64, tpu.core_type = #tpu.core_type<tc>} {
    tpu.enqueue_dma source(%arg0 : memref<2x4x16x16xf32, #tpu.memory_space<any>>) target(%arg1 : memref<2x4x16x16xf32, #tpu.memory_space<any>>) target_semaphore(%arg2 : memref<!tpu.dma_semaphore, #tpu.memory_space<semaphore_mem>>)
    tpu.wait_dma2 semaphore(%arg2 : memref<!tpu.dma_semaphore, #tpu.memory_space<semaphore_mem>>) src(%arg0 : memref<2x4x16x16xf32, #tpu.memory_space<any>>) dst(%arg1 : memref<2x4x16x16xf32, #tpu.memory_space<any>>)
    return
  }
}

</mosaic_0001>

<bundles_post_ra>
// kernel: tpu_custom_call.1
= control target key start
LH: loop header
LB: loop body
LE: loop exit
PB: predicated region body
PF: predicated region fallthrough
CT: control target
= control target key end

     0   :  { %s36_s6 = smov [#allocation2]   ;;  %s37_s7 = smov [#allocation3]   ;;  %s55_s0 = inlined_call_operand.hbm [shape: f32[2,4,16,16], index: 0, kind: input, shape index: {}]   ;;  %s56_s1 = inlined_call_operand.hbm [shape: f32[2,4,16,16], index: 1, kind: output, shape index: {}]  }
   0x1   :  { %s38_s8 = smov 0  }
   0x2   :  { %18 = dma.general %s55_s0, 2048, %s56_s1, %s36_s6, %s37_s7, [#allocation4], %s38_s8, 0  }
   0x3   :  { %34 = dma.done.wait [#allocation2], 2048 }
   0x4   :  { %35 = vsyncadd [#allocation2], 4294965248 }
   0x5   :  { %24 = vsyncmov [#allocation2] }
   0x8   :  { %s25_s13 = vpop.sfrf %24 }
   0x9   :  { %p30_p0 = scmp.ne.s32.totalorder %s25_s13, 0 }
   0xb   :  { %29 = shalt.err (%p30_p0)  }

</bundles_post_ra>
